<compile_context>
chip_gen: v7x
topology: tpu7x:2x2x1
jax: 0.10.0
libtpu: 0.0.40
codegen_flags: <defaults>
</compile_context>

<pallas_src>
import jax
import jax.numpy as jnp
from jax.experimental import pallas as pl
from jax.experimental.pallas import tpu as pltpu


# ----------------------------- Pallas kernel --------------------------------
def _primary_caps_kernel(x_ref, wp_ref, bp_ref, wa_ref, ba_ref, o_ref):
    # x_ref:  (tm, Kin)          input patch rows
    # wp_ref: (Kin, Cp), bp_ref: (1, Cp)   pose conv as GEMM
    # wa_ref: (Kin, B),  ba_ref: (1, B)    activation conv as GEMM
    # o_ref:  (tm, Cp + B)       fused output row tile (exact width, no pad)
    x = x_ref[...]
    pose = jnp.dot(x, wp_ref[...], preferred_element_type=jnp.float32,
                   precision=jax.lax.Precision.HIGHEST) + bp_ref[...]
    act = jnp.dot(x, wa_ref[...], preferred_element_type=jnp.float32,
                  precision=jax.lax.Precision.HIGHEST) + ba_ref[...]
    act = jax.nn.sigmoid(act)                 # EUP work only on the B act lanes
    o_ref[...] = jnp.concatenate([pose, act], axis=-1).astype(o_ref.dtype)


# ------------------------------ glue (JAX) -----------------------------------
def _im2col_nhwc(x_nhwc, K, stride):
    """Extract KxK patches with feature ordering (A, kh, kw) to match PyTorch's
    Conv2d weight layout (Cout, A, Kh, Kw) flattened."""
    N, H, W, A = x_nhwc.shape
    Ho = (H - K) // stride + 1
    Wo = (W - K) // stride + 1
    if K == 1:
        # 1x1 conv (default PrimaryCaps config): strided spatial subsample only.
        p = x_nhwc[:, ::stride, ::stride, :][:, :Ho, :Wo, :]
        return p.reshape(N, Ho, Wo, A), Ho, Wo
    # TODO(synk): for K > 1, fold this patch gather into the kernel via an extra
    # "arbitrary" kh*kw reduction grid axis (accumulate into VMEM scratch with
    # pl.when init/finalize) to kill the K^2 HBM read amplification.
    patches = []
    for kh in range(K):
        for kw in range(K):
            patches.append(
                x_nhwc[:, kh:kh + stride * Ho:stride, kw:kw + stride * Wo:stride, :]
            )
    p = jnp.stack(patches, axis=-2)          # (N, Ho, Wo, K*K, A)
    p = jnp.moveaxis(p, -1, -2)              # (N, Ho, Wo, A, K*K)
    return p.reshape(N, Ho, Wo, A * K * K), Ho, Wo


def _choose_tm(M, C, Kin, *, tm_cap=1024, min_steps=8, vmem_budget_bytes=20 << 20):
    """Row-tile selection.

    - multiple of 8 (sublane), <= tm_cap,
    - capped so double-buffered in+out tiles stay inside a conservative VMEM
      budget (portable across v5e/v6e 128 MiB and v7x 64 MiB / 32 MiB scoped),
    - gives >= min_steps grid steps when M allows (balanced work for v7x's two
      TensorCores + real pipeline depth),
    - prefers an exact divisor of M so there is no padded row / post-slice.
    """
    bytes_per_row = 2 * 4 * (Kin + C)                 # double-buffered f32 in+out
    tm_vmem = max(8, (vmem_budget_bytes // bytes_per_row) // 8 * 8)
    if M >= min_steps * 8:
        steps_bound = (M // min_steps) // 8 * 8
    else:
        steps_bound = max(8, ((M + 1) // 2 + 7) // 8 * 8)
    upper = max(8, min(tm_cap, tm_vmem, steps_bound))
    for cand in range(upper, 7, -8):                  # prefer no row padding
        if M % cand == 0:
            return cand
    return upper


def primary_caps_forward(x, w_pose, b_pose, w_a, b_a, *, K, P, stride,
                         out_dtype=None):
    """x: (N, A, H, W) float32 (NCHW, like PyTorch).
    Returns (N, H', W', B*P*P + B).  out_dtype=jnp.bfloat16 halves the dominant
    output-store traffic if the downstream EM-routing tolerates it."""
    N, A, H, W = x.shape
    B = w_a.shape[0]
    Cp = B * P * P                      # pose channels
    C = Cp + B                          # total output channels (exact, no pad)
    Kin = A * K * K
    out_dtype = x.dtype if out_dtype is None else out_dtype

    # TODO(synk): accept NHWC input directly (or fuse this transpose into the
    # producing layer) to drop one full HBM read+write of the activations.
    x_nhwc = jnp.transpose(x, (0, 2, 3, 1))               # NHWC
    patches, Ho, Wo = _im2col_nhwc(x_nhwc, K, stride)     # (N, Ho, Wo, Kin)
    M = N * Ho * Wo
    xm = patches.reshape(M, Kin)
    # Note: the (tm, Kin) LHS tile is lane-sparse (Kin << 128) but input bytes
    # are a small fraction of output bytes; left as-is per review (low priority).

    tm = _choose_tm(M, C, Kin)
    M_pad = pl.cdiv(M, tm) * tm
    if M_pad != M:
        xm = jnp.pad(xm, ((0, M_pad - M), (0, 0)))

    # PyTorch Conv2d weights (Cout, A, Kh, Kw) -> GEMM weights (Kin, Cout).
    wp = jnp.transpose(w_pose.reshape(Cp, Kin))           # (Kin, Cp)
    wa = jnp.transpose(w_a.reshape(B, Kin))               # (Kin, B)
    bp = b_pose.reshape(1, Cp)
    ba = b_a.reshape(1, B)

    out = pl.pallas_call(
        _primary_caps_kernel,
        out_shape=jax.ShapeDtypeStruct((M_pad, C), out_dtype),
        grid_spec=pltpu.PrefetchScalarGridSpec(
            num_scalar_prefetch=0,
            grid=(M_pad // tm,),
            in_specs=[
                pl.BlockSpec((tm, Kin), lambda i: (i, 0)),   # input row tile
                pl.BlockSpec((Kin, Cp), lambda i: (0, 0)),   # pose weight (resident)
                pl.BlockSpec((1, Cp), lambda i: (0, 0)),     # pose bias
                pl.BlockSpec((Kin, B), lambda i: (0, 0)),    # act weight (resident)
                pl.BlockSpec((1, B), lambda i: (0, 0)),      # act bias
            ],
            out_specs=pl.BlockSpec((tm, C), lambda i: (i, 0)),
        ),
        compiler_params=pltpu.CompilerParams(
            dimension_semantics=("parallel",)),
    )(xm, wp, bp, wa, ba)

    if M_pad != M:
        out = out[:M]
    return out.reshape(N, Ho, Wo, C)


# ----------------------------- reference (JAX) --------------------------------
def primary_caps_reference(x, w_pose, b_pose, w_a, b_a, *, K, P, stride):
    dn = jax.lax.conv_dimension_numbers(x.shape, w_pose.shape, ("NCHW", "OIHW", "NCHW"))
    prec = jax.lax.Precision.HIGHEST
    p = jax.lax.conv_general_dilated(x, w_pose, (stride, stride), "VALID",
                                     dimension_numbers=dn, precision=prec)
    p = p + b_pose[None, :, None, None]
    a = jax.lax.conv_general_dilated(x, w_a, (stride, stride), "VALID",
                                     dimension_numbers=dn, precision=prec)
    a = jax.nn.sigmoid(a + b_a[None, :, None, None])
    out = jnp.concatenate([p, a], axis=1)
    return jnp.transpose(out, (0, 2, 3, 1))


# --------------------------------- main ---------------------------------------
if __name__ == "__main__":
    # Small shapes consistent with the module (A input channels, B capsule
    # types, P*P pose, K=1 conv as in the default PrimaryCaps config).
    # B=8, P=4 keeps the pose block (Cp=128) lane-dense like the real config.
    N, A, H, W = 2, 8, 16, 16
    B, P, K, stride = 8, 4, 1, 1
    Cp = B * P * P

    key = jax.random.PRNGKey(0)
    kx, kwp, kbp, kwa, kba = jax.random.split(key, 5)

    x = jax.random.normal(kx, (N, A, H, W), dtype=jnp.float32)

    # Deterministic Conv2d-style init (uniform in +/- 1/sqrt(fan_in)).
    fan_in = A * K * K
    bound = 1.0 / float(jnp.sqrt(fan_in))
    w_pose = jax.random.uniform(kwp, (Cp, A, K, K), jnp.float32, -bound, bound)
    b_pose = jax.random.uniform(kbp, (Cp,), jnp.float32, -bound, bound)
    w_a = jax.random.uniform(kwa, (B, A, K, K), jnp.float32, -bound, bound)
    b_a = jax.random.uniform(kba, (B,), jnp.float32, -bound, bound)

    out = primary_caps_forward(x, w_pose, b_pose, w_a, b_a, K=K, P=P, stride=stride)
    out = jax.block_until_ready(out)

    ref = primary_caps_reference(x, w_pose, b_pose, w_a, b_a, K=K, P=P, stride=stride)
    assert out.shape == (N, H, W, Cp + B), out.shape
    assert jnp.allclose(out, ref, atol=1e-5, rtol=1e-5), "mismatch vs reference"

    print("KERNEL_OK")
</pallas_src>

<mosaic_0001>
module attributes {stable_mosaic.version = 11 : i64} {
  func.func @_primary_caps_kernel(%arg0: i32, %arg1: memref<64x8xf32, #tpu.memory_space<vmem>>, %arg2: memref<8x128xf32, #tpu.memory_space<vmem>>, %arg3: memref<1x128xf32, #tpu.memory_space<vmem>>, %arg4: memref<8x8xf32, #tpu.memory_space<vmem>>, %arg5: memref<1x8xf32, #tpu.memory_space<vmem>>, %arg6: memref<64x136xf32, #tpu.memory_space<vmem>>) attributes {dimension_semantics = [#tpu.dimension_semantics<parallel>], iteration_bounds = array<i64: 8>, scalar_prefetch = 0 : i64, scratch_operands = 0 : i64, tpu.core_type = #tpu.core_type<tc>, window_params = [{transform_indices = @transform_0, window_bounds = array<i64: 64, 8>}, {pipeline_mode = #tpu.pipeline_mode<synchronous>, transform_indices = @transform_1, window_bounds = array<i64: 8, 128>}, {pipeline_mode = #tpu.pipeline_mode<synchronous>, transform_indices = @transform_2, window_bounds = array<i64: 1, 128>}, {pipeline_mode = #tpu.pipeline_mode<synchronous>, transform_indices = @transform_3, window_bounds = array<i64: 8, 8>}, {pipeline_mode = #tpu.pipeline_mode<synchronous>, transform_indices = @transform_4, window_bounds = array<i64: 1, 8>}, {transform_indices = @transform_5, window_bounds = array<i64: 64, 136>}]} {
    %c0 = arith.constant 0 : index
    %c0_0 = arith.constant 0 : index
    %0 = vector.load %arg1[%c0, %c0_0] : memref<64x8xf32, #tpu.memory_space<vmem>>, vector<64x8xf32>
    %c0_1 = arith.constant 0 : index
    %c0_2 = arith.constant 0 : index
    %1 = vector.load %arg2[%c0_1, %c0_2] : memref<8x128xf32, #tpu.memory_space<vmem>>, vector<8x128xf32>
    %cst = arith.constant dense<0.000000e+00> : vector<64x128xf32>
    %2 = tpu.matmul %0, %1, %cst {dimension_numbers = #tpu.dot_dimension_numbers<[1], [0], [0], [1], [0, 0, 1, 1], [], []>, precision = #tpu.contract_precision<fp32>} : vector<64x8xf32>, vector<8x128xf32>, vector<64x128xf32> -> vector<64x128xf32>
    %c0_3 = arith.constant 0 : index
    %c0_4 = arith.constant 0 : index
    %3 = vector.load %arg3[%c0_3, %c0_4] : memref<1x128xf32, #tpu.memory_space<vmem>>, vector<1x128xf32>
    %4 = vector.broadcast %3 : vector<1x128xf32> to vector<64x128xf32>
    %5 = arith.addf %2, %4 : vector<64x128xf32>
    %c0_5 = arith.constant 0 : index
    %c0_6 = arith.constant 0 : index
    %6 = vector.load %arg4[%c0_5, %c0_6] : memref<8x8xf32, #tpu.memory_space<vmem>>, vector<8x8xf32>
    %cst_7 = arith.constant dense<0.000000e+00> : vector<64x8xf32>
    %7 = tpu.matmul %0, %6, %cst_7 {dimension_numbers = #tpu.dot_dimension_numbers<[1], [0], [0], [1], [0, 0, 1, 1], [], []>, precision = #tpu.contract_precision<fp32>} : vector<64x8xf32>, vector<8x8xf32>, vector<64x8xf32> -> vector<64x8xf32>
    %c0_8 = arith.constant 0 : index
    %c0_9 = arith.constant 0 : index
    %8 = vector.load %arg5[%c0_8, %c0_9] : memref<1x8xf32, #tpu.memory_space<vmem>>, vector<1x8xf32>
    %9 = vector.broadcast %8 : vector<1x8xf32> to vector<64x8xf32>
    %10 = arith.addf %7, %9 : vector<64x8xf32>
    %11 = arith.negf %10 : vector<64x8xf32>
    %12 = math.exp %11 : vector<64x8xf32>
    %cst_10 = arith.constant 1.000000e+00 : f32
    %13 = vector.broadcast %cst_10 : f32 to vector<64x8xf32>
    %14 = arith.addf %13, %12 : vector<64x8xf32>
    %15 = arith.divf %13, %14 : vector<64x8xf32>
    %16 = tpu.concatenate %5, %15 in 1 : vector<64x128xf32>, vector<64x8xf32> -> vector<64x136xf32>
    %c0_11 = arith.constant 0 : index
    %c0_12 = arith.constant 0 : index
    %17 = vector.load %arg6[%c0_11, %c0_12] : memref<64x136xf32, #tpu.memory_space<vmem>>, vector<64x136xf32>
    tpu.vector_store %arg6[%c0_11, %c0_12], %16 {strides = array<i32>} : memref<64x136xf32, #tpu.memory_space<vmem>>, vector<64x136xf32>,
    return
  }
  func.func @transform_0(%arg0: i32) -> (i32, i32) {
    %c0_i32 = arith.constant 0 : i32
    %c0_i32_0 = arith.constant 0 : i32
    return %arg0, %c0_i32 : i32, i32
  }
  func.func @transform_1(%arg0: i32) -> (i32, i32) {
    %c0_i32 = arith.constant 0 : i32
    %c0_i32_0 = arith.constant 0 : i32
    %c0_i32_1 = arith.constant 0 : i32
    return %c0_i32, %c0_i32_0 : i32, i32
  }
  func.func @transform_2(%arg0: i32) -> (i32, i32) {
    %c0_i32 = arith.constant 0 : i32
    %c0_i32_0 = arith.constant 0 : i32
    %c0_i32_1 = arith.constant 0 : i32
    return %c0_i32, %c0_i32_0 : i32, i32
  }
  func.func @transform_3(%arg0: i32) -> (i32, i32) {
    %c0_i32 = arith.constant 0 : i32
    %c0_i32_0 = arith.constant 0 : i32
    %c0_i32_1 = arith.constant 0 : i32
    return %c0_i32, %c0_i32_0 : i32, i32
  }
  func.func @transform_4(%arg0: i32) -> (i32, i32) {
    %c0_i32 = arith.constant 0 : i32
    %c0_i32_0 = arith.constant 0 : i32
    %c0_i32_1 = arith.constant 0 : i32
    return %c0_i32, %c0_i32_0 : i32, i32
  }
  func.func @transform_5(%arg0: i32) -> (i32, i32) {
    %c0_i32 = arith.constant 0 : i32
    %c0_i32_0 = arith.constant 0 : i32
    return %arg0, %c0_i32 : i32, i32
  }
}

</mosaic_0001>

<bundles_post_ra>
// kernel: tpu_custom_call.1
= control target key start
LH: loop header
LB: loop body
LE: loop exit
PB: predicated region body
PF: predicated region fallthrough
CT: control target
= control target key end

     0   :  { %s2368_s18 = smov 0   ;;  %s2635_s0 = inlined_call_operand.vmem [shape: f32[512,8], index: 0, kind: input, shape index: {}]   ;;  %s2636_s1 = inlined_call_operand.vmem [shape: f32[8,128], index: 1, kind: input, shape index: {}]   ;;  %s2637_s2 = inlined_call_operand.vmem [shape: f32[1,128], index: 2, kind: input, shape index: {}]   ;;  %s2638_s3 = inlined_call_operand.vmem [shape: f32[8,8], index: 3, kind: input, shape index: {}]   ;;  %s2639_s4 = inlined_call_operand.vmem [shape: f32[1,8], index: 4, kind: input, shape index: {}]   ;;  %s2640_s5 = inlined_call_operand.vmem [shape: f32[512,136], index: 5, kind: output, shape index: {}]  }
   0x1 LB: > { %s1895_s19 = sadd.s32 4294967295, %s2336_s18   ;;  %p1899_p0 = scmp.ge.s32.totalorder %s2336_s18, 1  ;;  %s2336_s18 = sphi %s2368_s18, %s15_s18  }
   0x2   : > { %p188_p1 = scmp.lt.s32.totalorder %s2336_s18, 9 }
   0x4   : > { %p189_p2 = pnand %p1899_p0, %p188_p1 }
   0x5   : > { %v1018_v0 = vld [vmem:[%s2638_s3] sm:$0xff] (!%p189_p2)  ;;  %s1900_s24 = sshll.u32 (!%p189_p2), %s1895_s19, 3  ;;  %vm246_vm0 = vcmask (!%p189_p2), 64512  }
   0x6   : > { %192 = sbr.rel (%p189_p2) target bundleno = 365 (0x16d), region = 40  ;;  %v238_v1 = vld [vmem:[%s2636_s1] sm:$0xff] (!%p189_p2)  ;;  %v2382_v2 = vand.u32 (!%p189_p2), 4294901760, %v1018_v0  ;;  %p218_p3 = scmp.lt.s32.totalorder (!%p189_p2), %s1900_s24, 63 }
   0x7   : > { %v2384_v3 = vand.u32 (!%p189_p2), 4294901760, %v238_v1 }
   0x8   : > { %2110 = vmatprep.subr.mxu1 (!%p189_p2), %v2382_v2  ;;  %v2391_v4 = vsub.f32 (!%p189_p2), %v1018_v0, %v2382_v2 }
   0x9   : > { %2026 = vmatprep.subr.mxu0 (!%p189_p2), %v2384_v3  ;;  %v2394_v5 = vsub.f32 (!%p189_p2), %v238_v1, %v2384_v3  ;;  %2111 = vmatpush3.msra.mxu1 (!%p189_p2), %v2382_v2 }
   0xa   : > { %2027 = vmatpush3.msra.mxu0 (!%p189_p2), %v2384_v3  ;;  %v2400_v6 = vand.u32 (!%p189_p2), 4294901760, %v2391_v4 }
   0xb   : > { %v2403_v7 = vand.u32 (!%p189_p2), 4294901760, %v2394_v5 }
   0xc   : > { %v1176_v9 = vsub.f32 (!%p189_p2), %v2391_v4, %v2400_v6 }
   0xd   : > { %s2642_s24 = smov (!%p218_p3, %s1900_s24), 63  ;;  %v421_v18 = vsub.f32 %v2394_v5, %v2403_v7 }
   0xe   : > { %s1901_s25 = sshll.u32 %s2642_s24, 3  ;;  %v1177_v20 = vand.u32 4294901760, %v1176_v9  ;;  %s1917_s29 = sshll.u32 %s2642_s24, 4 }
   0xf   : > { %s221_s28 = scalar_lea.vmem %s2635_s0, %s1901_s25  ;;  %v422_v58 = vand.u32 4294901760, %v421_v18  ;;  %s2606_s11 = scalar_lea.vmem %s2640_s5, %s1917_s29 }
  0x10   : > { %v230_v8 = vld [vmem:[%s221_s28] sm:$0xff]  ;;  %v231_v10 = vld [vmem:[%s221_s28 + $0x8] sm:$0xff]  ;;  %v232_v11 = vld [vmem:[%s221_s28 + $0x10] sm:$0xff]  ;;  %2124 = vmatprep.subr.mxu1 %v1177_v20 }
  0x11   : > { %v248_v12 = vsel %vm246_vm0, %v230_v8, 0  ;;  %v251_v13 = vsel %vm246_vm0, %v231_v10, 0  ;;  %v254_v14 = vsel %vm246_vm0, %v232_v11, 0  ;;  %v233_v15 = vld [vmem:[%s221_s28 + $0x18] sm:$0xff]  ;;  %v234_v16 = vld [vmem:[%s221_s28 + $0x20] sm:$0xff]  ;;  %v235_v17 = vld [vmem:[%s221_s28 + $0x28] sm:$0xff]  ;;  %2040 = vmatprep.subr.mxu0 %v422_v58 }
  0x12   : > { %v2415_v19 = vand.u32 4294901760, %v248_v12  ;;  %v2417_v21 = vand.u32 4294901760, %v251_v13  ;;  %v2419_v22 = vand.u32 4294901760, %v254_v14  ;;  %v236_v23 = vld [vmem:[%s221_s28 + $0x30] sm:$0xff]  ;;  %v237_v24 = vld [vmem:[%s221_s28 + $0x38] sm:$0xff]  ;;  %v257_v25 = vsel %vm246_vm0, %v233_v15, 0 }
  0x13   : > { %v260_v26 = vsel %vm246_vm0, %v234_v16, 0  ;;  %v263_v27 = vsel %vm246_vm0, %v235_v17, 0  ;;  %v266_v28 = vsel %vm246_vm0, %v236_v23, 0  ;;  %v2434_v32 = vand.u32 4294901760, %v257_v25 }
  0x14   : > { %v2426_v29 = vsub.f32 %v248_v12, %v2415_v19  ;;  %v2429_v30 = vsub.f32 %v251_v13, %v2417_v21  ;;  %v2432_v31 = vsub.f32 %v254_v14, %v2419_v22  ;;  %v2436_v33 = vand.u32 4294901760, %v260_v26 }
  0x15   : > { %v2438_v34 = vand.u32 4294901760, %v263_v27  ;;  %v2440_v35 = vand.u32 4294901760, %v266_v28  ;;  %v269_v36 = vsel %vm246_vm0, %v237_v24, 0  ;;  %v2453_v40 = vsub.f32 %v257_v25, %v2434_v32 }
  0x16   : > { %v2444_v37 = vand.u32 4294901760, %v2426_v29  ;;  %v2447_v38 = vand.u32 4294901760, %v2429_v30  ;;  %v2450_v39 = vand.u32 4294901760, %v2432_v31  ;;  %v2456_v41 = vsub.f32 %v260_v26, %v2436_v33 }
  0x17   : > { %v2459_v42 = vsub.f32 %v263_v27, %v2438_v34  ;;  %v2462_v43 = vsub.f32 %v266_v28, %v2440_v35  ;;  %v2464_v44 = vand.u32 4294901760, %v269_v36  ;;  %v2473_v48 = vand.u32 4294901760, %v2453_v40 }
  0x18   : > { %v340_v45 = vsub.f32 %v2426_v29, %v2444_v37  ;;  %v350_v46 = vsub.f32 %v2429_v30, %v2447_v38  ;;  %v360_v47 = vsub.f32 %v2432_v31, %v2450_v39  ;;  %v2476_v49 = vand.u32 4294901760, %v2456_v41 }
  0x19   : > { %v2479_v50 = vand.u32 4294901760, %v2459_v42  ;;  %v2482_v51 = vand.u32 4294901760, %v2462_v43  ;;  %v2485_v52 = vsub.f32 %v269_v36, %v2464_v44  ;;  %v370_v56 = vsub.f32 %v2453_v40, %v2473_v48 }
  0x1a   : > { %v341_v53 = vand.u32 4294901760, %v340_v45  ;;  %v351_v54 = vand.u32 4294901760, %v350_v46  ;;  %v361_v55 = vand.u32 4294901760, %v360_v47  ;;  %v380_v57 = vsub.f32 %v2456_v41, %v2476_v49 }
  0x1b   : > { %v371_v59 = vand.u32 4294901760, %v370_v56  ;;  %v390_v60 = vsub.f32 %v2459_v42, %v2479_v50  ;;  %v2494_v61 = vand.u32 4294901760, %v2485_v52  ;;  %v400_v63 = vsub.f32 %v2462_v43, %v2482_v51 }
  0x1c   : > { %2028 = vmatprep.mubr.f32.mxu0 %v341_v53  ;;  %2112 = vmatprep.mubr.f32.mxu1 %v341_v53  ;;  %v381_v62 = vand.u32 4294901760, %v380_v57 }
  0x1d   : > { %2029 = vmatmul.mubr.f32.vlgmr.msra.gmra.mrb[0].mxu0 %v351_v54  ;;  %2113 = vmatmul.mubr.f32.vlgmr.msra.gmra.mrb[0].mxu1 %v351_v54  ;;  %v391_v0 = vand.u32 4294901760, %v390_v60  ;;  %v410_v1 = vsub.f32 %v2485_v52, %v2494_v61  ;;  %v401_v8 = vand.u32 4294901760, %v400_v63 }
  0x1e   : > { %2125 = vmatpush3.msra.mxu1 %v1177_v20  ;;  %2031 = vmatprep.mubr.f32.mxu0 %v361_v55 }
  0x1f   : > { %2115 = vmatprep.mubr.f32.mxu1 %v361_v55  ;;  %2041 = vmatpush3.msra.mxu0 %v422_v58  ;;  %v411_v9 = vand.u32 4294901760, %v410_v1 }
  0x20   : > { %2138 = vmatprep.subr.mxu1 %v2391_v4  ;;  %2054 = vmatprep.subr.mxu0 %v2394_v5 }
  0x21   : > { %2032 = vmatmul.mubr.f32.gmra.mrb[2].mxu0 %v371_v59  ;;  %2116 = vmatmul.mubr.f32.gmra.mrb[2].mxu1 %v371_v59 }
  0x22   : > { %2034 = vmatprep.mubr.f32.mxu0 %v381_v62  ;;  %2118 = vmatprep.mubr.f32.mxu1 %v381_v62 }
  0x25   : > { %2035 = vmatmul.mubr.f32.gmra.mrb[4].mxu0 %v391_v0  ;;  %2119 = vmatmul.mubr.f32.gmra.mrb[4].mxu1 %v391_v0 }
  0x26   : > { %2037 = vmatprep.mubr.f32.mxu0 %v401_v8  ;;  %2121 = vmatprep.mubr.f32.mxu1 %v401_v8 }
  0x29   : > { %2038 = vmatmul.mubr.f32.gmra.mrb[6].mxu0 %v411_v9  ;;  %2122 = vmatmul.mubr.f32.gmra.mrb[6].mxu1 %v411_v9 }
  0x2a   : > { %2042 = vmatprep.mubr.f32.mxu0 %v2415_v19  ;;  %2126 = vmatprep.mubr.f32.mxu1 %v2415_v19 }
  0x2d   : > { %2043 = vmatmul.mubr.f32.vlgmr.msra.gmra.mrb[0].mxu0 %v2417_v21  ;;  %2127 = vmatmul.mubr.f32.vlgmr.msra.gmra.mrb[0].mxu1 %v2417_v21 }
  0x2e   : > { %2139 = vmatpush3.msra.mxu1 %v2391_v4  ;;  %2045 = vmatprep.mubr.f32.mxu0 %v2419_v22 }
  0x2f   : > { %2129 = vmatprep.mubr.f32.mxu1 %v2419_v22  ;;  %2055 = vmatpush3.msra.mxu0 %v2394_v5 }
  0x30   : > { %2152 = vmatprep.subr.mxu1 %v2382_v2  ;;  %2068 = vmatprep.subr.mxu0 %v2384_v3 }
  0x31   : > { %2046 = vmatmul.mubr.f32.gmra.mrb[2].mxu0 %v2434_v32  ;;  %2130 = vmatmul.mubr.f32.gmra.mrb[2].mxu1 %v2434_v32 }
  0x32   : > { %2048 = vmatprep.mubr.f32.mxu0 %v2436_v33  ;;  %2132 = vmatprep.mubr.f32.mxu1 %v2436_v33 }
  0x35   : > { %2049 = vmatmul.mubr.f32.gmra.mrb[4].mxu0 %v2438_v34  ;;  %2133 = vmatmul.mubr.f32.gmra.mrb[4].mxu1 %v2438_v34 }
  0x36   : > { %2051 = vmatprep.mubr.f32.mxu0 %v2440_v35  ;;  %2135 = vmatprep.mubr.f32.mxu1 %v2440_v35 }
  0x39   : > { %2052 = vmatmul.mubr.f32.gmra.mrb[6].mxu0 %v2464_v44  ;;  %2136 = vmatmul.mubr.f32.gmra.mrb[6].mxu1 %v2464_v44 }
  0x3a   : > { %2056 = vmatprep.mubr.f32.mxu0 %v2426_v29  ;;  %2140 = vmatprep.mubr.f32.mxu1 %v2426_v29 }
  0x3d   : > { %2057 = vmatmul.mubr.f32.vlgmr.msra.gmra.mrb[0].mxu0 %v2429_v30  ;;  %2141 = vmatmul.mubr.f32.vlgmr.msra.gmra.mrb[0].mxu1 %v2429_v30 }
  0x3e   : > { %2153 = vmatpush3.msra.mxu1 %v2382_v2  ;;  %2059 = vmatprep.mubr.f32.mxu0 %v2432_v31 }
  0x3f   : > { %2143 = vmatprep.mubr.f32.mxu1 %v2432_v31  ;;  %2069 = vmatpush3.msra.mxu0 %v2384_v3 }
  0x40   : > { %2166 = vmatprep.subr.mxu1 %v2400_v6  ;;  %2082 = vmatprep.subr.mxu0 %v2403_v7 }
  0x41   : > { %2060 = vmatmul.mubr.f32.gmra.mrb[2].mxu0 %v2453_v40  ;;  %2144 = vmatmul.mubr.f32.gmra.mrb[2].mxu1 %v2453_v40 }
  0x42   : > { %2062 = vmatprep.mubr.f32.mxu0 %v2456_v41  ;;  %2146 = vmatprep.mubr.f32.mxu1 %v2456_v41 }
  0x45   : > { %2063 = vmatmul.mubr.f32.gmra.mrb[4].mxu0 %v2459_v42  ;;  %2147 = vmatmul.mubr.f32.gmra.mrb[4].mxu1 %v2459_v42 }
  0x46   : > { %2065 = vmatprep.mubr.f32.mxu0 %v2462_v43  ;;  %2149 = vmatprep.mubr.f32.mxu1 %v2462_v43 }
  0x49   : > { %2066 = vmatmul.mubr.f32.gmra.mrb[6].mxu0 %v2485_v52  ;;  %2150 = vmatmul.mubr.f32.gmra.mrb[6].mxu1 %v2485_v52 }
  0x4a   : > { %2070 = vmatprep.mubr.f32.mxu0 %v2444_v37  ;;  %2154 = vmatprep.mubr.f32.mxu1 %v2444_v37 }
  0x4d   : > { %2071 = vmatmul.mubr.f32.vlgmr.msra.gmra.mrb[0].mxu0 %v2447_v38  ;;  %2155 = vmatmul.mubr.f32.vlgmr.msra.gmra.mrb[0].mxu1 %v2447_v38 }
  0x4e   : > { %2167 = vmatpush3.msra.mxu1 %v2400_v6  ;;  %2073 = vmatprep.mubr.f32.mxu0 %v2450_v39 }
  0x4f   : > { %2157 = vmatprep.mubr.f32.mxu1 %v2450_v39  ;;  %2083 = vmatpush3.msra.mxu0 %v2403_v7 }
  0x50   : > { %2180 = vmatprep.subr.mxu1 %v2382_v2  ;;  %2096 = vmatprep.subr.mxu0 %v2384_v3 }
  0x51   : > { %2074 = vmatmul.mubr.f32.gmra.mrb[2].mxu0 %v2473_v48  ;;  %2158 = vmatmul.mubr.f32.gmra.mrb[2].mxu1 %v2473_v48 }
  0x52   : > { %2076 = vmatprep.mubr.f32.mxu0 %v2476_v49  ;;  %2160 = vmatprep.mubr.f32.mxu1 %v2476_v49 }
  0x55   : > { %2077 = vmatmul.mubr.f32.gmra.mrb[4].mxu0 %v2479_v50  ;;  %2161 = vmatmul.mubr.f32.gmra.mrb[4].mxu1 %v2479_v50 }
  0x56   : > { %2079 = vmatprep.mubr.f32.mxu0 %v2482_v51  ;;  %2163 = vmatprep.mubr.f32.mxu1 %v2482_v51 }
  0x59   : > { %2080 = vmatmul.mubr.f32.gmra.mrb[6].mxu0 %v2494_v61  ;;  %2164 = vmatmul.mubr.f32.gmra.mrb[6].mxu1 %v2494_v61 }
  0x5a   : > { %2084 = vmatprep.mubr.f32.mxu0 %v2415_v19  ;;  %2168 = vmatprep.mubr.f32.mxu1 %v2415_v19 }
  0x5d   : > { %2085 = vmatmul.mubr.f32.vlgmr.msra.gmra.mrb[0].mxu0 %v2417_v21  ;;  %2169 = vmatmul.mubr.f32.vlgmr.msra.gmra.mrb[0].mxu1 %v2417_v21 }
  0x5e   : > { %2181 = vmatpush3.msra.mxu1 %v2382_v2  ;;  %2087 = vmatprep.mubr.f32.mxu0 %v2419_v22  ;;  %v1905_v2 = vld [vmem:[%s2637_s2] ss:$0 sm:$0xff] }
  0x5f   : > { %2171 = vmatprep.mubr.f32.mxu1 %v2419_v22  ;;  %2097 = vmatpush3.msra.mxu0 %v2384_v3  ;;  %v1906_v3 = vld [vmem:[%s2639_s4] ss:$0 sm:$0xff] }
  0x61   : > { %2088 = vmatmul.mubr.f32.gmra.mrb[2].mxu0 %v2434_v32  ;;  %2172 = vmatmul.mubr.f32.gmra.mrb[2].mxu1 %v2434_v32 }
  0x62   : > { %2090 = vmatprep.mubr.f32.mxu0 %v2436_v33  ;;  %2174 = vmatprep.mubr.f32.mxu1 %v2436_v33 }
  0x65   : > { %2091 = vmatmul.mubr.f32.gmra.mrb[4].mxu0 %v2438_v34  ;;  %2175 = vmatmul.mubr.f32.gmra.mrb[4].mxu1 %v2438_v34 }
  0x66   : > { %2093 = vmatprep.mubr.f32.mxu0 %v2440_v35  ;;  %2177 = vmatprep.mubr.f32.mxu1 %v2440_v35 }
  0x69   : > { %2094 = vmatmul.mubr.f32.gmra.mrb[6].mxu0 %v2464_v44  ;;  %2178 = vmatmul.mubr.f32.gmra.mrb[6].mxu1 %v2464_v44 }
  0x6a   : > { %2098 = vmatprep.mubr.f32.mxu0 %v2415_v19  ;;  %2182 = vmatprep.mubr.f32.mxu1 %v2415_v19 }
  0x6d   : > { %2099 = vmatmul.mubr.f32.vlgmr.msra.gmra.mrb[0].mxu0 %v2417_v21  ;;  %2183 = vmatmul.mubr.f32.vlgmr.msra.gmra.mrb[0].mxu1 %v2417_v21 }
  0x6e   : > { %2101 = vmatprep.mubr.f32.mxu0 %v2419_v22  ;;  %2185 = vmatprep.mubr.f32.mxu1 %v2419_v22 }
  0x71   : > { %2102 = vmatmul.mubr.f32.gmra.mrb[2].mxu0 %v2434_v32  ;;  %2186 = vmatmul.mubr.f32.gmra.mrb[2].mxu1 %v2434_v32 }
  0x72   : > { %2104 = vmatprep.mubr.f32.mxu0 %v2436_v33  ;;  %2188 = vmatprep.mubr.f32.mxu1 %v2436_v33 }
  0x75   : > { %2105 = vmatmul.mubr.f32.gmra.mrb[4].mxu0 %v2438_v34  ;;  %2189 = vmatmul.mubr.f32.gmra.mrb[4].mxu1 %v2438_v34 }
  0x76   : > { %2107 = vmatprep.mubr.f32.mxu0 %v2440_v35  ;;  %2191 = vmatprep.mubr.f32.mxu1 %v2440_v35 }
  0x79   : > { %2108 = vmatmul.mubr.f32.gmra.mrb[6].mxu0 %v2464_v44  ;;  %2192 = vmatmul.mubr.f32.gmra.mrb[6].mxu1 %v2464_v44 }
 0x140   : > { %v2100_v4 = vpop.f32.mrb[0].mxu0  ;;  %v2184_v5 = vpop.f32.mrb[0].mxu1 }
 0x141   : > { %v2194_v6 = vadd.f32 %v2100_v4, %v1905_v2  ;;  %v2202_v7 = vadd.f32 %v2184_v5, %v1906_v3  ;;  %v972_v10 = vpop.f32.mrb[1].mxu0  ;;  %v1727_v11 = vpop.f32.mrb[1].mxu1 }
 0x142   : > { %v2195_v12 = vadd.f32 %v1905_v2, %v972_v10  ;;  %v2203_v13 = vadd.f32 %v1906_v3, %v1727_v11 }
 0x143   : > { %1823 = vst [vmem:[%s2606_s11 + $0x10] sm:$0xff] %v2194_v6  ;;  %v1908_v14 = vmul.f32 -1.442695, %v2202_v7 }
 0x144   : > { %1821 = vst [vmem:[%s2606_s11] sm:$0xff] %v2195_v12  ;;  %v1907_v15 = vmul.f32 -1.442695, %v2203_v13  ;;  %v2103_v16 = vpop.f32.mrb[2].mxu0  ;;  %v2187_v17 = vpop.f32.mrb[2].mxu1 }
 0x145   : > { %2298 = vpow2.f32 %v1908_v14  ;;  %v2196_v18 = vadd.f32 %v2103_v16, %v1905_v2  ;;  %v2204_v19 = vadd.f32 %v2187_v17, %v1906_v3  ;;  %v984_v20 = vpop.f32.mrb[3].mxu0  ;;  %v1739_v21 = vpop.f32.mrb[3].mxu1 }
 0x146   : > { %2300 = vpow2.f32 %v1907_v15  ;;  %v2197_v22 = vadd.f32 %v1905_v2, %v984_v20  ;;  %v2205_v23 = vadd.f32 %v1906_v3, %v1739_v21 }
 0x147   : > { %1827 = vst [vmem:[%s2606_s11 + $0x30] sm:$0xff] %v2196_v18  ;;  %v1910_v24 = vmul.f32 -1.442695, %v2204_v19 }
 0x148   : > { %1825 = vst [vmem:[%s2606_s11 + $0x20] sm:$0xff] %v2197_v22  ;;  %v1909_v25 = vmul.f32 -1.442695, %v2205_v23  ;;  %v2106_v26 = vpop.f32.mrb[4].mxu0  ;;  %v2190_v27 = vpop.f32.mrb[4].mxu1 }
 0x149   : > { %2302 = vpow2.f32 %v1910_v24  ;;  %v2198_v28 = vadd.f32 %v2106_v26, %v1905_v2  ;;  %v2206_v29 = vadd.f32 %v2190_v27, %v1906_v3  ;;  %v996_v30 = vpop.f32.mrb[5].mxu0  ;;  %v1751_v31 = vpop.f32.mrb[5].mxu1 }
 0x14a   : > { %2304 = vpow2.f32 %v1909_v25  ;;  %v2199_v32 = vadd.f32 %v1905_v2, %v996_v30  ;;  %v2207_v33 = vadd.f32 %v1906_v3, %v1751_v31 }
 0x14b   : > { %1831 = vst [vmem:[%s2606_s11 + $0x50] sm:$0xff] %v2198_v28  ;;  %v1912_v34 = vmul.f32 -1.442695, %v2206_v29 }
 0x14c   : > { %1829 = vst [vmem:[%s2606_s11 + $0x40] sm:$0xff] %v2199_v32  ;;  %v1911_v35 = vmul.f32 -1.442695, %v2207_v33  ;;  %v2109_v36 = vpop.f32.mrb[6].mxu0  ;;  %v2193_v37 = vpop.f32.mrb[6].mxu1 }
 0x14d   : > { %2306 = vpow2.f32 %v1912_v34  ;;  %v2200_v38 = vadd.f32 %v2109_v36, %v1905_v2  ;;  %v2208_v39 = vadd.f32 %v2193_v37, %v1906_v3  ;;  %v1008_v40 = vpop.f32.mrb[7].mxu0  ;;  %v1763_v41 = vpop.f32.mrb[7].mxu1 }
 0x14e   : > { %2308 = vpow2.f32 %v1911_v35  ;;  %v2201_v42 = vadd.f32 %v1905_v2, %v1008_v40  ;;  %v2209_v43 = vadd.f32 %v1906_v3, %v1763_v41 }
 0x14f   : > { %v2299_v44 = vpop.eup %2298  ;;  %1835 = vst [vmem:[%s2606_s11 + $0x70] sm:$0xff] %v2200_v38  ;;  %v1914_v45 = vmul.f32 -1.442695, %v2208_v39 }
 0x150   : > { %v2301_v46 = vpop.eup %2300  ;;  %v1798_v47 = vadd.f32 1.0, %v2299_v44  ;;  %1833 = vst [vmem:[%s2606_s11 + $0x60] sm:$0xff] %v2201_v42  ;;  %v1913_v48 = vmul.f32 -1.442695, %v2209_v43 }
 0x151   : > { %v1797_v49 = vadd.f32 1.0, %v2301_v46  ;;  %2310 = vpow2.f32 %v1914_v45 }
 0x152   : > { %2312 = vrcp.f32 %v1798_v47 }
 0x153   : > { %v2303_v50 = vpop.eup %2302  ;;  %2314 = vrcp.f32 %v1797_v49 }
 0x154   : > { %v2305_v51 = vpop.eup %2304  ;;  %v1800_v52 = vadd.f32 1.0, %v2303_v50  ;;  %2316 = vpow2.f32 %v1913_v48 }
 0x155   : > { %v1799_v53 = vadd.f32 1.0, %v2305_v51 }
 0x156   : > { %2318 = vrcp.f32 %v1800_v52 }
 0x157   : > { %v2307_v54 = vpop.eup %2306  ;;  %2320 = vrcp.f32 %v1799_v53 }
 0x158   : > { %v2309_v55 = vpop.eup %2308  ;;  %v1802_v56 = vadd.f32 1.0, %v2307_v54 }
 0x159   : > { %v1801_v57 = vadd.f32 1.0, %v2309_v55 }
 0x15a   : > { %2322 = vrcp.f32 %v1802_v56 }
 0x15b   : > { %v2311_v58 = vpop.eup %2310  ;;  %2324 = vrcp.f32 %v1801_v57 }
 0x15c   : > { %v2313_v59 = vpop.eup %2312  ;;  %v1804_v60 = vadd.f32 1.0, %v2311_v58 }
 0x15d   : > { %v2315_v61 = vpop.eup %2314  ;;  %1824 = vst.msk [vmem:[%s2606_s11 + $0x18] sm:$0xff] %vm246_vm0, %v2313_v59 }
 0x15e   : > { %v2317_v62 = vpop.eup %2316  ;;  %1822 = vst.msk [vmem:[%s2606_s11 + $0x8] sm:$0xff] %vm246_vm0, %v2315_v61  ;;  %2326 = vrcp.f32 %v1804_v60 }
 0x15f   : > { %v1803_v63 = vadd.f32 1.0, %v2317_v62 }
 0x160   : > { %v2319_v0 = vpop.eup %2318 }
 0x161   : > { %v2321_v1 = vpop.eup %2320  ;;  %1828 = vst.msk [vmem:[%s2606_s11 + $0x38] sm:$0xff] %vm246_vm0, %v2319_v0  ;;  %2328 = vrcp.f32 %v1803_v63 }
 0x162   : > { %1826 = vst.msk [vmem:[%s2606_s11 + $0x28] sm:$0xff] %vm246_vm0, %v2321_v1 }
 0x164   : > { %v2323_v8 = vpop.eup %2322 }
 0x165   : > { %v2325_v9 = vpop.eup %2324  ;;  %1832 = vst.msk [vmem:[%s2606_s11 + $0x58] sm:$0xff] %vm246_vm0, %v2323_v8 }
 0x166   : > { %1830 = vst.msk [vmem:[%s2606_s11 + $0x48] sm:$0xff] %vm246_vm0, %v2325_v9 }
 0x168   : > { %v2327_v2 = vpop.eup %2326 }
 0x169   : > { %1836 = vst.msk [vmem:[%s2606_s11 + $0x78] sm:$0xff] %vm246_vm0, %v2327_v2 }
 0x16b   : > { %v2329_v3 = vpop.eup %2328 }
 0x16c   : > { %1834 = vst.msk [vmem:[%s2606_s11 + $0x68] sm:$0xff] %vm246_vm0, %v2329_v3 }
 0x16d PF: > { %s15_s18 = sadd.s32 1, %s2336_s18  }
 0x16e   : > { %p12_p4 = scmp.ge.s32.totalorder %s15_s18, 10  }
 0x170   :  { %14 = sbr.rel (!%p12_p4) target bundleno = 1 (0x1), region = 70 }

</bundles_post_ra>
